<compile_context>
chip_gen: v6e
topology: v6e:2x2x1
jax: 0.10.0
libtpu: 0.0.40
codegen_flags: <defaults>
</compile_context>

<pallas_src>
import functools

import jax
import jax.numpy as jnp
from jax.experimental import pallas as pl
from jax.experimental.pallas import tpu as pltpu

# ----------------------------- configuration -------------------------------
B = 2                          # batch
C, H, W = 3, 16, 16
FLAT = C * H * W               # 768 flattened pixel features
HIDDEN = 32                    # stand-in for image_encoder.config.hidden_size
INTER = 32                     # intermediate_dim (kept small)
NUM_LABELS = 8                 # stand-in for len(one_hot.classes_)

LANES = 128                    # TPU lane width
SUBLANES = 8                   # f32 sublane height
# packed head-weight row offsets: [w1 ; w2 ; wc] stacked along the row axis
_ROW_W1 = 0
_ROW_W2 = HIDDEN                     # 32
_ROW_WC = HIDDEN + 2 * INTER         # 96
_W_ROWS = HIDDEN + 2 * INTER + INTER # 128


# ------------------------------ Pallas kernels ------------------------------
def _mlp_logits(x, we, bpk, wpk):
    """Pooler stand-in + MLP head + classifier, all f32.

    x   : [BP, FLAT]      batch padded to a multiple of 8
    we  : [FLAT, HIDDEN]  pooler projection
    bpk : [8, 128]        packed biases   (rows 0..3 = be, b1, b2, bc)
    wpk : [128, 128]      packed weights  (w1 / w2 / wc, zero padded)
    returns [BP, 128] logits; lanes >= NUM_LABELS are exactly zero.
    """
    # simplified image-encoder pooler: Linear + tanh
    pooled = jnp.tanh(
        jnp.dot(x, we, preferred_element_type=jnp.float32)
        + bpk[0:1, 0:HIDDEN])                                     # [BP, HIDDEN]
    # Linear(HIDDEN, 2*INTER) + ReLU   (Dropout(0.4) identity at inference)
    a1 = jnp.maximum(
        jnp.dot(pooled, wpk[_ROW_W1:_ROW_W2, 0:2 * INTER],
                preferred_element_type=jnp.float32)
        + bpk[1:2, 0:2 * INTER], 0.0)                             # [BP, 2*INTER]
    # Linear(2*INTER, INTER) + ReLU    (Dropout(0.4) identity at inference)
    a2 = jnp.maximum(
        jnp.dot(a1, wpk[_ROW_W2:_ROW_WC, 0:INTER],
                preferred_element_type=jnp.float32)
        + bpk[2:3, 0:INTER], 0.0)                                 # [BP, INTER]
    # classifier Linear(INTER, NUM_LABELS) evaluated over all 128 lanes
    # (weight/bias lanes >= NUM_LABELS are zero) -> lane-dense output store.
    return (jnp.dot(a2, wpk[_ROW_WC:_W_ROWS, :],
                    preferred_element_type=jnp.float32)
            + bpk[3:4, :])                                        # [BP, 128]


def _head_kernel(x_ref, we_ref, b_ref, w_ref, logits_ref):
    """Logits-only forward (labels is None)."""
    logits_ref[...] = _mlp_logits(x_ref[...], we_ref[...], b_ref[...], w_ref[...])


def _head_loss_kernel(x_ref, lab_ref, we_ref, b_ref, w_ref,
                      logits_ref, loss_ref, *, n_valid_rows):
    """Forward + fused BCEWithLogitsLoss (mean over the real B*NUM_LABELS elems)."""
    z = _mlp_logits(x_ref[...], we_ref[...], b_ref[...], w_ref[...])
    logits_ref[...] = z                                           # [BP, 128]
    y = lab_ref[...]                                              # [BP, 128]
    row = jax.lax.broadcasted_iota(jnp.int32, z.shape, 0)
    col = jax.lax.broadcasted_iota(jnp.int32, z.shape, 1)
    valid = (row < n_valid_rows) & (col < NUM_LABELS)
    # numerically stable BCE-with-logits: max(z,0) - z*y + log(1 + exp(-|z|))
    per = (jnp.maximum(z, 0.0) - z * y
           + jnp.log(1.0 + jnp.exp(-jnp.abs(z))))
    per = jnp.where(valid, per, 0.0)
    loss_ref[0, 0] = jnp.sum(per) / jnp.float32(n_valid_rows * NUM_LABELS)


# ------------------------------ host wrappers -------------------------------
def _pad_rows(a, rows):
    return jnp.pad(a, ((0, rows - a.shape[0]), (0, 0)))


def concept_detection_forward(pixel_values, params, labels=None):
    """pixel_values: f32 [B, C, H, W] (NCHW).  Returns dict with 'logits'
    (and 'loss' if labels given), matching the PyTorch forward."""
    b = pixel_values.shape[0]
    x = pixel_values.reshape(b, -1).astype(jnp.float32)           # [B, FLAT]
    bp = max(SUBLANES, ((b + SUBLANES - 1) // SUBLANES) * SUBLANES)
    x = _pad_rows(x, bp)                                          # [BP, FLAT]

    vmem = pl.BlockSpec(memory_space=pltpu.MemorySpace.VMEM)
    smem = pl.BlockSpec(memory_space=pltpu.MemorySpace.SMEM)

    if labels is None:
        logits_full = pl.pallas_call(
            _head_kernel,
            out_shape=jax.ShapeDtypeStruct((bp, LANES), jnp.float32),
            in_specs=[vmem, vmem, vmem, vmem],
            out_specs=vmem,
        )(x, params["we"], params["bias_pack"], params["w_pack"])
        loss = None
    else:
        y = jnp.asarray(labels, jnp.float32)
        y = jnp.pad(y, ((0, bp - y.shape[0]), (0, LANES - y.shape[1])))
        logits_full, loss_arr = pl.pallas_call(
            functools.partial(_head_loss_kernel, n_valid_rows=b),
            out_shape=(jax.ShapeDtypeStruct((bp, LANES), jnp.float32),
                       jax.ShapeDtypeStruct((1, 1), jnp.float32)),
            in_specs=[vmem, vmem, vmem, vmem, vmem],
            out_specs=(vmem, smem),
        )(x, y, params["we"], params["bias_pack"], params["w_pack"])
        loss = loss_arr[0, 0]

    logits = logits_full[:b, :NUM_LABELS]
    if b == 1:
        logits = logits[0]   # mirror PyTorch pooler_output.squeeze() for B == 1
    out = {"logits": logits}
    if loss is not None:
        out["loss"] = loss
    return out


def init_raw_params(key):
    ks = jax.random.split(key, 8)
    s = 0.02
    return {
        # TODO(synk): pretrained HF AutoModel image encoder has no in-script
        # Pallas equivalent; substituted by flatten -> Linear -> tanh pooler.
        "we": s * jax.random.normal(ks[0], (FLAT, HIDDEN), jnp.float32),
        "be": jnp.zeros((HIDDEN,), jnp.float32),
        # nn.Linear(hidden_size, intermediate_dim * 2)
        "w1": s * jax.random.normal(ks[1], (HIDDEN, 2 * INTER), jnp.float32),
        "b1": s * jax.random.normal(ks[2], (2 * INTER,), jnp.float32),
        # nn.Linear(intermediate_dim * 2, intermediate_dim)
        "w2": s * jax.random.normal(ks[3], (2 * INTER, INTER), jnp.float32),
        "b2": s * jax.random.normal(ks[4], (INTER,), jnp.float32),
        # classifier nn.Linear(intermediate_dim, num_labels)
        "wc": s * jax.random.normal(ks[5], (INTER, NUM_LABELS), jnp.float32),
        "bc": s * jax.random.normal(ks[6], (NUM_LABELS,), jnp.float32),
    }


def pack_params(raw):
    """Pack the 4 biases and 3 head weights into 2 lane-dense arrays."""
    bpk = jnp.zeros((SUBLANES, LANES), jnp.float32)
    bpk = bpk.at[0, 0:HIDDEN].set(raw["be"])
    bpk = bpk.at[1, 0:2 * INTER].set(raw["b1"])
    bpk = bpk.at[2, 0:INTER].set(raw["b2"])
    bpk = bpk.at[3, 0:NUM_LABELS].set(raw["bc"])
    wpk = jnp.zeros((_W_ROWS, LANES), jnp.float32)
    wpk = wpk.at[_ROW_W1:_ROW_W2, 0:2 * INTER].set(raw["w1"])
    wpk = wpk.at[_ROW_W2:_ROW_WC, 0:INTER].set(raw["w2"])
    wpk = wpk.at[_ROW_WC:_W_ROWS, 0:NUM_LABELS].set(raw["wc"])
    return {"we": raw["we"], "bias_pack": bpk, "w_pack": wpk}


def reference_forward(pixel_values, raw, labels=None):
    """Pure-JAX reference for correctness checking."""
    x = pixel_values.reshape(pixel_values.shape[0], -1)
    pooled = jnp.tanh(x @ raw["we"] + raw["be"])
    a1 = jnp.maximum(pooled @ raw["w1"] + raw["b1"], 0.0)
    a2 = jnp.maximum(a1 @ raw["w2"] + raw["b2"], 0.0)
    logits = a2 @ raw["wc"] + raw["bc"]
    out = {"logits": logits}
    if labels is not None:
        z = logits
        y = labels.astype(jnp.float32)
        per = (jnp.maximum(z, 0.0) - z * y
               + jnp.log(1.0 + jnp.exp(-jnp.abs(z))))
        out["loss"] = jnp.mean(per)
    return out


if __name__ == "__main__":
    key = jax.random.PRNGKey(0)
    k_px, k_lab, k_par = jax.random.split(key, 3)

    pixel_values = jax.random.normal(k_px, (B, C, H, W), jnp.float32)
    labels = (jax.random.uniform(k_lab, (B, NUM_LABELS)) > 0.5).astype(jnp.float32)

    raw = init_raw_params(k_par)
    params = pack_params(raw)

    # fused logits + BCE loss path
    out = concept_detection_forward(pixel_values, params, labels=labels)
    jax.block_until_ready(out["logits"])
    jax.block_until_ready(out["loss"])

    # logits-only path
    out_nl = concept_detection_forward(pixel_values, params, labels=None)
    jax.block_until_ready(out_nl["logits"])

    # sanity: shapes, finiteness, agreement with the pure-JAX reference
    assert out["logits"].shape == (B, NUM_LABELS)
    assert out_nl["logits"].shape == (B, NUM_LABELS)
    assert bool(jnp.all(jnp.isfinite(out["logits"])))
    assert bool(jnp.isfinite(out["loss"]))

    ref = reference_forward(pixel_values, raw, labels=labels)
    assert bool(jnp.allclose(out["logits"], ref["logits"], rtol=1e-1, atol=1e-2))
    assert bool(jnp.allclose(out_nl["logits"], ref["logits"], rtol=1e-1, atol=1e-2))
    assert bool(jnp.allclose(out["loss"], ref["loss"], rtol=1e-1, atol=1e-2))

    print("KERNEL_OK")
</pallas_src>

<mosaic_0001>
module attributes {stable_mosaic.version = 11 : i64} {
  func.func @_head_loss_kernel(%arg0: memref<8x768xf32, #tpu.memory_space<vmem>>, %arg1: memref<8x128xf32, #tpu.memory_space<vmem>>, %arg2: memref<768x32xf32, #tpu.memory_space<vmem>>, %arg3: memref<8x128xf32, #tpu.memory_space<vmem>>, %arg4: memref<128x128xf32, #tpu.memory_space<vmem>>, %arg5: memref<8x128xf32, #tpu.memory_space<vmem>>, %arg6: memref<1x1xf32, #tpu.memory_space<smem>>) attributes {dimension_semantics = [], scalar_prefetch = 0 : i64, scratch_operands = 0 : i64, tpu.core_type = #tpu.core_type<tc>} {
    %c0 = arith.constant 0 : index
    %c0_0 = arith.constant 0 : index
    %0 = vector.load %arg0[%c0, %c0_0] : memref<8x768xf32, #tpu.memory_space<vmem>>, vector<8x768xf32>
    %c0_1 = arith.constant 0 : index
    %c0_2 = arith.constant 0 : index
    %1 = vector.load %arg2[%c0_1, %c0_2] : memref<768x32xf32, #tpu.memory_space<vmem>>, vector<768x32xf32>
    %c0_3 = arith.constant 0 : index
    %c0_4 = arith.constant 0 : index
    %2 = vector.load %arg3[%c0_3, %c0_4] : memref<8x128xf32, #tpu.memory_space<vmem>>, vector<8x128xf32>
    %c0_5 = arith.constant 0 : index
    %c0_6 = arith.constant 0 : index
    %3 = vector.load %arg4[%c0_5, %c0_6] : memref<128x128xf32, #tpu.memory_space<vmem>>, vector<128x128xf32>
    %cst = arith.constant dense<0.000000e+00> : vector<8x32xf32>
    %4 = tpu.matmul %0, %1, %cst {dimension_numbers = #tpu.dot_dimension_numbers<[1], [0], [0], [1], [0, 0, 1, 1], [], []>} : vector<8x768xf32>, vector<768x32xf32>, vector<8x32xf32> -> vector<8x32xf32>
    %5 = vector.extract_strided_slice %2 {offsets = [0, 0], sizes = [1, 32], strides = [1, 1]} : vector<8x128xf32> to vector<1x32xf32>
    %6 = vector.broadcast %5 : vector<1x32xf32> to vector<8x32xf32>
    %7 = arith.addf %4, %6 : vector<8x32xf32>
    %8 = math.tanh %7 : vector<8x32xf32>
    %9 = vector.extract_strided_slice %3 {offsets = [0, 0], sizes = [32, 64], strides = [1, 1]} : vector<128x128xf32> to vector<32x64xf32>
    %cst_7 = arith.constant dense<0.000000e+00> : vector<8x64xf32>
    %10 = tpu.matmul %8, %9, %cst_7 {dimension_numbers = #tpu.dot_dimension_numbers<[1], [0], [0], [1], [0, 0, 1, 1], [], []>} : vector<8x32xf32>, vector<32x64xf32>, vector<8x64xf32> -> vector<8x64xf32>
    %11 = vector.extract_strided_slice %2 {offsets = [1, 0], sizes = [1, 64], strides = [1, 1]} : vector<8x128xf32> to vector<1x64xf32>
    %12 = vector.broadcast %11 : vector<1x64xf32> to vector<8x64xf32>
    %13 = arith.addf %10, %12 : vector<8x64xf32>
    %cst_8 = arith.constant 0.000000e+00 : f32
    %14 = vector.broadcast %cst_8 : f32 to vector<8x64xf32>
    %15 = arith.maximumf %13, %14 : vector<8x64xf32>
    %16 = vector.extract_strided_slice %3 {offsets = [32, 0], sizes = [64, 32], strides = [1, 1]} : vector<128x128xf32> to vector<64x32xf32>
    %cst_9 = arith.constant dense<0.000000e+00> : vector<8x32xf32>
    %17 = tpu.matmul %15, %16, %cst_9 {dimension_numbers = #tpu.dot_dimension_numbers<[1], [0], [0], [1], [0, 0, 1, 1], [], []>} : vector<8x64xf32>, vector<64x32xf32>, vector<8x32xf32> -> vector<8x32xf32>
    %18 = vector.extract_strided_slice %2 {offsets = [2, 0], sizes = [1, 32], strides = [1, 1]} : vector<8x128xf32> to vector<1x32xf32>
    %19 = vector.broadcast %18 : vector<1x32xf32> to vector<8x32xf32>
    %20 = arith.addf %17, %19 : vector<8x32xf32>
    %cst_10 = arith.constant 0.000000e+00 : f32
    %21 = vector.broadcast %cst_10 : f32 to vector<8x32xf32>
    %22 = arith.maximumf %20, %21 : vector<8x32xf32>
    %23 = vector.extract_strided_slice %3 {offsets = [96, 0], sizes = [32, 128], strides = [1, 1]} : vector<128x128xf32> to vector<32x128xf32>
    %cst_11 = arith.constant dense<0.000000e+00> : vector<8x128xf32>
    %24 = tpu.matmul %22, %23, %cst_11 {dimension_numbers = #tpu.dot_dimension_numbers<[1], [0], [0], [1], [0, 0, 1, 1], [], []>} : vector<8x32xf32>, vector<32x128xf32>, vector<8x128xf32> -> vector<8x128xf32>
    %25 = vector.extract_strided_slice %2 {offsets = [3, 0], sizes = [1, 128], strides = [1, 1]} : vector<8x128xf32> to vector<1x128xf32>
    %26 = vector.broadcast %25 : vector<1x128xf32> to vector<8x128xf32>
    %27 = arith.addf %24, %26 : vector<8x128xf32>
    %c0_12 = arith.constant 0 : index
    %c0_13 = arith.constant 0 : index
    %28 = vector.load %arg5[%c0_12, %c0_13] : memref<8x128xf32, #tpu.memory_space<vmem>>, vector<8x128xf32>
    tpu.vector_store %arg5[%c0_12, %c0_13], %27 {strides = array<i32>} : memref<8x128xf32, #tpu.memory_space<vmem>>, vector<8x128xf32>,
    %c0_14 = arith.constant 0 : index
    %c0_15 = arith.constant 0 : index
    %29 = vector.load %arg1[%c0_14, %c0_15] : memref<8x128xf32, #tpu.memory_space<vmem>>, vector<8x128xf32>
    %30 = tpu.iota {dimensions = array<i32: 0>} : vector<8x128xi32>
    %31 = tpu.iota {dimensions = array<i32: 1>} : vector<8x128xi32>
    %c2_i32 = arith.constant 2 : i32
    %32 = vector.broadcast %c2_i32 : i32 to vector<8x128xi32>
    %33 = arith.cmpi slt, %30, %32 : vector<8x128xi32>
    %c8_i32 = arith.constant 8 : i32
    %34 = vector.broadcast %c8_i32 : i32 to vector<8x128xi32>
    %35 = arith.cmpi slt, %31, %34 : vector<8x128xi32>
    %36 = arith.andi %33, %35 : vector<8x128xi1>
    %cst_16 = arith.constant 0.000000e+00 : f32
    %37 = vector.broadcast %cst_16 : f32 to vector<8x128xf32>
    %38 = arith.maximumf %27, %37 : vector<8x128xf32>
    %39 = arith.mulf %27, %29 : vector<8x128xf32>
    %40 = arith.subf %38, %39 : vector<8x128xf32>
    %41 = math.absf %27 : vector<8x128xf32>
    %cst_17 = arith.constant 0.000000e+00 : f32
    %42 = vector.broadcast %cst_17 : f32 to vector<8x128xf32>
    %43 = arith.subf %42, %41 : vector<8x128xf32>
    %44 = math.exp %43 : vector<8x128xf32>
    %cst_18 = arith.constant 1.000000e+00 : f32
    %45 = vector.broadcast %cst_18 : f32 to vector<8x128xf32>
    %46 = arith.addf %45, %44 : vector<8x128xf32>
    %47 = math.log %46 : vector<8x128xf32>
    %48 = arith.addf %40, %47 : vector<8x128xf32>
    %cst_19 = arith.constant 0.000000e+00 : f32
    %49 = vector.broadcast %cst_19 : f32 to vector<8x128xf32>
    %50 = arith.select %36, %48, %49 : vector<8x128xi1>, vector<8x128xf32>
    %51 = vector.shape_cast %50 : vector<8x128xf32> to vector<1x8x128xf32>
    %cst_20 = arith.constant dense<0.000000e+00> : vector<1xf32>
    %52 = vector.multi_reduction <add>, %51, %cst_20 [1, 2] : vector<1x8x128xf32> to vector<1xf32>
    %53 = vector.shape_cast %52 : vector<1xf32> to vector<1x1x1xf32>
    %54 = vector.extract %53[0, 0, 0] : f32 from vector<1x1x1xf32>
    %cst_21 = arith.constant 1.600000e+01 : f32
    %55 = arith.divf %54, %cst_21 : f32
    %c0_22 = arith.constant 0 : index
    %c0_23 = arith.constant 0 : index
    %56 = memref.load %arg6[%c0_22, %c0_23] : memref<1x1xf32, #tpu.memory_space<smem>>
    memref.store %55, %arg6[%c0_22, %c0_23] : memref<1x1xf32, #tpu.memory_space<smem>>
    return
  }
}

</mosaic_0001>

<bundles_post_ra>
// kernel: tpu_custom_call.1
= control target key start
LH: loop header
LB: loop body
LE: loop exit
PB: predicated region body
PF: predicated region fallthrough
CT: control target
= control target key end

     0   :  { %12 = vsyncpa [#allocation3], 0  ;;  %s1311_s0 = inlined_call_operand.vmem [shape: f32[8,768], index: 0, kind: input, shape index: {}]   ;;  %s1312_s1 = inlined_call_operand.vmem [shape: f32[8,128], index: 1, kind: input, shape index: {}]   ;;  %s1313_s2 = inlined_call_operand.vmem [shape: f32[768,32], index: 2, kind: input, shape index: {}]   ;;  %s1314_s3 = inlined_call_operand.vmem [shape: f32[8,128], index: 3, kind: input, shape index: {}]   ;;  %s1315_s4 = inlined_call_operand.vmem [shape: f32[128,128], index: 4, kind: input, shape index: {}]   ;;  %s1316_s5 = inlined_call_operand.hbm [shape: f32[8,128], index: 5, kind: output, shape index: {0}]   ;;  %s1317_s6 = inlined_call_operand.hbm [shape: f32[1,1], index: 6, kind: output, shape index: {1}]  }
   0x1   :  { %v61_v0 = vld [vmem:[%s1313_s2 + $0xf8] sm:$0xff]  ;;  %v60_v2 = vld [vmem:[%s1313_s2 + $0xf0] sm:$0xff]  ;;  %v59_v6 = vld [vmem:[%s1313_s2 + $0xe8] sm:$0xff] }
   0x2   :  { %v45_v1 = vld [vmem:[%s1313_s2 + $0x78] sm:$0xff]  ;;  %658 = vmatprep.subr.mxu0 %v61_v0  ;;  %v44_v4 = vld [vmem:[%s1313_s2 + $0x70] sm:$0xff]  ;;  %v43_v8 = vld [vmem:[%s1313_s2 + $0x68] sm:$0xff] }
   0x3   :  { %v93_v3 = vld [vmem:[%s1313_s2 + $0x1f8] sm:$0xff]  ;;  %659 = vmatpush3.msra.mxu0 %v45_v1  ;;  %v92_v7 = vld [vmem:[%s1313_s2 + $0x1f0] sm:$0xff]  ;;  %v91_v10 = vld [vmem:[%s1313_s2 + $0x1e8] sm:$0xff] }
   0x4   :  { %v77_v5 = vld [vmem:[%s1313_s2 + $0x178] sm:$0xff]  ;;  %693 = vmatprep.subr.mxu1 %v93_v3  ;;  %660 = vmatprep.subr.mxu0 %v60_v2  ;;  %v76_v9 = vld [vmem:[%s1313_s2 + $0x170] sm:$0xff]  ;;  %v58_v11 = vld [vmem:[%s1313_s2 + $0xe0] sm:$0xff] }
   0x5   :  { %694 = vmatpush3.msra.mxu1 %v77_v5  ;;  %661 = vmatpush3.msra.mxu0 %v44_v4  ;;  %v75_v12 = vld [vmem:[%s1313_s2 + $0x168] sm:$0xff]  ;;  %v42_v13 = vld [vmem:[%s1313_s2 + $0x60] sm:$0xff]  ;;  %v57_v15 = vld [vmem:[%s1313_s2 + $0xd8] sm:$0xff] }
   0x6   :  { %695 = vmatprep.subr.mxu1 %v92_v7  ;;  %662 = vmatprep.subr.mxu0 %v59_v6  ;;  %v90_v14 = vld [vmem:[%s1313_s2 + $0x1e0] sm:$0xff]  ;;  %v41_v17 = vld [vmem:[%s1313_s2 + $0x58] sm:$0xff]  ;;  %v56_v19 = vld [vmem:[%s1313_s2 + $0xd0] sm:$0xff] }
   0x7   :  { %696 = vmatpush3.msra.mxu1 %v76_v9  ;;  %663 = vmatpush3.msra.mxu0 %v43_v8  ;;  %v74_v16 = vld [vmem:[%s1313_s2 + $0x160] sm:$0xff]  ;;  %v89_v18 = vld [vmem:[%s1313_s2 + $0x1d8] sm:$0xff]  ;;  %v40_v21 = vld [vmem:[%s1313_s2 + $0x50] sm:$0xff] }
   0x8   :  { %697 = vmatprep.subr.mxu1 %v91_v10  ;;  %664 = vmatprep.subr.mxu0 %v58_v11  ;;  %v73_v20 = vld [vmem:[%s1313_s2 + $0x158] sm:$0xff]  ;;  %v88_v22 = vld [vmem:[%s1313_s2 + $0x1d0] sm:$0xff]  ;;  %v55_v23 = vld [vmem:[%s1313_s2 + $0xc8] sm:$0xff] }
   0x9   :  { %698 = vmatpush3.msra.mxu1 %v75_v12  ;;  %665 = vmatpush3.msra.mxu0 %v42_v13  ;;  %v72_v24 = vld [vmem:[%s1313_s2 + $0x150] sm:$0xff]  ;;  %v39_v25 = vld [vmem:[%s1313_s2 + $0x48] sm:$0xff]  ;;  %v54_v27 = vld [vmem:[%s1313_s2 + $0xc0] sm:$0xff] }
   0xa   :  { %699 = vmatprep.subr.mxu1 %v90_v14  ;;  %666 = vmatprep.subr.mxu0 %v57_v15  ;;  %v87_v26 = vld [vmem:[%s1313_s2 + $0x1c8] sm:$0xff]  ;;  %v38_v29 = vld [vmem:[%s1313_s2 + $0x40] sm:$0xff]  ;;  %v53_v31 = vld [vmem:[%s1313_s2 + $0xb8] sm:$0xff] }
   0xb   :  { %700 = vmatpush3.msra.mxu1 %v74_v16  ;;  %667 = vmatpush3.msra.mxu0 %v41_v17  ;;  %v71_v28 = vld [vmem:[%s1313_s2 + $0x148] sm:$0xff]  ;;  %v86_v30 = vld [vmem:[%s1313_s2 + $0x1c0] sm:$0xff]  ;;  %v37_v33 = vld [vmem:[%s1313_s2 + $0x38] sm:$0xff] }
   0xc   :  { %701 = vmatprep.subr.mxu1 %v89_v18  ;;  %668 = vmatprep.subr.mxu0 %v56_v19  ;;  %v70_v32 = vld [vmem:[%s1313_s2 + $0x140] sm:$0xff]  ;;  %v85_v34 = vld [vmem:[%s1313_s2 + $0x1b8] sm:$0xff]  ;;  %v52_v35 = vld [vmem:[%s1313_s2 + $0xb0] sm:$0xff] }
   0xd   :  { %702 = vmatpush3.msra.mxu1 %v73_v20  ;;  %669 = vmatpush3.msra.mxu0 %v40_v21  ;;  %v69_v36 = vld [vmem:[%s1313_s2 + $0x138] sm:$0xff]  ;;  %v36_v37 = vld [vmem:[%s1313_s2 + $0x30] sm:$0xff]  ;;  %v51_v39 = vld [vmem:[%s1313_s2 + $0xa8] sm:$0xff] }
   0xe   :  { %703 = vmatprep.subr.mxu1 %v88_v22  ;;  %670 = vmatprep.subr.mxu0 %v55_v23  ;;  %v84_v38 = vld [vmem:[%s1313_s2 + $0x1b0] sm:$0xff]  ;;  %v35_v41 = vld [vmem:[%s1313_s2 + $0x28] sm:$0xff]  ;;  %v50_v43 = vld [vmem:[%s1313_s2 + $0xa0] sm:$0xff] }
   0xf   :  { %704 = vmatpush3.msra.mxu1 %v72_v24  ;;  %671 = vmatpush3.msra.mxu0 %v39_v25  ;;  %v68_v40 = vld [vmem:[%s1313_s2 + $0x130] sm:$0xff]  ;;  %v83_v42 = vld [vmem:[%s1313_s2 + $0x1a8] sm:$0xff]  ;;  %v34_v45 = vld [vmem:[%s1313_s2 + $0x20] sm:$0xff] }
  0x10   :  { %705 = vmatprep.subr.mxu1 %v87_v26  ;;  %672 = vmatprep.subr.mxu0 %v54_v27  ;;  %v67_v44 = vld [vmem:[%s1313_s2 + $0x128] sm:$0xff]  ;;  %v82_v46 = vld [vmem:[%s1313_s2 + $0x1a0] sm:$0xff]  ;;  %v49_v47 = vld [vmem:[%s1313_s2 + $0x98] sm:$0xff] }
  0x11   :  { %706 = vmatpush3.msra.mxu1 %v71_v28  ;;  %673 = vmatpush3.msra.mxu0 %v38_v29  ;;  %v66_v48 = vld [vmem:[%s1313_s2 + $0x120] sm:$0xff]  ;;  %v33_v49 = vld [vmem:[%s1313_s2 + $0x18] sm:$0xff]  ;;  %v48_v51 = vld [vmem:[%s1313_s2 + $0x90] sm:$0xff] }
  0x12   :  { %707 = vmatprep.subr.mxu1 %v86_v30  ;;  %674 = vmatprep.subr.mxu0 %v53_v31  ;;  %v81_v50 = vld [vmem:[%s1313_s2 + $0x198] sm:$0xff]  ;;  %v32_v53 = vld [vmem:[%s1313_s2 + $0x10] sm:$0xff]  ;;  %v47_v55 = vld [vmem:[%s1313_s2 + $0x88] sm:$0xff] }
  0x13   :  { %708 = vmatpush3.msra.mxu1 %v70_v32  ;;  %675 = vmatpush3.msra.mxu0 %v37_v33  ;;  %v65_v52 = vld [vmem:[%s1313_s2 + $0x118] sm:$0xff]  ;;  %v80_v54 = vld [vmem:[%s1313_s2 + $0x190] sm:$0xff]  ;;  %v31_v57 = vld [vmem:[%s1313_s2 + $0x8] sm:$0xff] }
  0x14   :  { %709 = vmatprep.subr.mxu1 %v85_v34  ;;  %676 = vmatprep.subr.mxu0 %v52_v35  ;;  %v64_v56 = vld [vmem:[%s1313_s2 + $0x110] sm:$0xff]  ;;  %v79_v58 = vld [vmem:[%s1313_s2 + $0x188] sm:$0xff]  ;;  %v46_v59 = vld [vmem:[%s1313_s2 + $0x80] sm:$0xff] }
  0x15   :  { %710 = vmatpush3.msra.mxu1 %v69_v36  ;;  %677 = vmatpush3.msra.mxu0 %v36_v37  ;;  %v25_v60 = vld [vmem:[%s1311_s0 + $0x8] sm:$0xff]  ;;  %v30_v61 = vld [vmem:[%s1313_s2] sm:$0xff]  ;;  %v125_v1 = vld [vmem:[%s1313_s2 + $0x2f8] sm:$0xff] }
  0x16   :  { %711 = vmatprep.subr.mxu1 %v84_v38  ;;  %678 = vmatprep.subr.mxu0 %v51_v39  ;;  %v63_v62 = vld [vmem:[%s1313_s2 + $0x108] sm:$0xff]  ;;  %v24_v63 = vld [vmem:[%s1311_s0] sm:$0xff]  ;;  %v27_v3 = vld [vmem:[%s1311_s0 + $0x18] sm:$0xff] }
  0x17   :  { %712 = vmatpush3.msra.mxu1 %v68_v40  ;;  %679 = vmatpush3.msra.mxu0 %v35_v41  ;;  %v78_v0 = vld [vmem:[%s1313_s2 + $0x180] sm:$0xff]  ;;  %v109_v4 = vld [vmem:[%s1313_s2 + $0x278] sm:$0xff]  ;;  %v26_v5 = vld [vmem:[%s1311_s0 + $0x10] sm:$0xff] }
  0x18   :  { %713 = vmatprep.subr.mxu1 %v83_v42  ;;  %680 = vmatprep.subr.mxu0 %v50_v43  ;;  %v62_v2 = vld [vmem:[%s1313_s2 + $0x100] sm:$0xff]  ;;  %v124_v6 = vld [vmem:[%s1313_s2 + $0x2f0] sm:$0xff]  ;;  %v29_v8 = vld [vmem:[%s1311_s0 + $0x28] sm:$0xff] }
  0x19   :  { %714 = vmatpush3.msra.mxu1 %v67_v44  ;;  %681 = vmatpush3.msra.mxu0 %v34_v45  ;;  %v108_v7 = vld [vmem:[%s1313_s2 + $0x270] sm:$0xff] }
  0x1a   :  { %715 = vmatprep.subr.mxu1 %v82_v46  ;;  %682 = vmatprep.subr.mxu0 %v49_v47 }
  0x1b   :  { %716 = vmatpush3.msra.mxu1 %v66_v48  ;;  %683 = vmatpush3.msra.mxu0 %v33_v49 }
  0x1c   :  { %717 = vmatprep.subr.mxu1 %v81_v50  ;;  %684 = vmatprep.subr.mxu0 %v48_v51 }
  0x1d   :  { %718 = vmatpush3.msra.mxu1 %v65_v52  ;;  %685 = vmatpush3.msra.mxu0 %v32_v53 }
  0x1e   :  { %719 = vmatprep.subr.mxu1 %v80_v54  ;;  %686 = vmatprep.subr.mxu0 %v47_v55 }
  0x1f   :  { %720 = vmatpush3.msra.mxu1 %v64_v56  ;;  %687 = vmatpush3.msra.mxu0 %v31_v57 }
  0x20   :  { %721 = vmatprep.subr.mxu1 %v79_v58  ;;  %688 = vmatprep.subr.mxu0 %v46_v59 }
  0x21   :  { %211 = vmatprep.mubr.f32.mxu0 %v25_v60  ;;  %689 = vmatpush3.msra.mxu0 %v30_v61 }
  0x22   :  { %722 = vmatpush3.msra.mxu1 %v63_v62  ;;  %212 = vmatmul.mubr.f32.vlgmr.msra.gmra.mxu0 %v24_v63 }
  0x23   :  { %723 = vmatprep.subr.mxu1 %v78_v0  ;;  %728 = vmatprep.subr.mxu0 %v125_v1 }
  0x24   :  { %724 = vmatpush3.msra.mxu1 %v62_v2 }
  0x25   :  { %13 = vsyncpa [#allocation4], 0  ;;  %281 = vmatprep.mubr.f32.mxu1 %v27_v3  ;;  %729 = vmatpush3.msra.mxu0 %v109_v4  ;;  %v123_v9 = vld [vmem:[%s1313_s2 + $0x2e8] sm:$0xff]  ;;  %v122_v11 = vld [vmem:[%s1313_s2 + $0x2e0] sm:$0xff]  ;;  %v867_v39 = vmov 0.0   ;;  %vm868_vm0 = vmmov 0   ;;  %v143_v43 = vlaneseq }
  0x26   :  { %282 = vmatmul.mubr.f32.vlgmr.msra.gmra.mxu1 %v26_v5  ;;  %730 = vmatprep.subr.mxu0 %v124_v6  ;;  %v107_v10 = vld [vmem:[%s1313_s2 + $0x268] sm:$0xff]  ;;  %v106_v12 = vld [vmem:[%s1313_s2 + $0x260] sm:$0xff]  ;;  %v121_v13 = vld [vmem:[%s1313_s2 + $0x2d8] sm:$0xff]  ;;  %vm362_vm1 = vcmask 261120   ;;  %vm441_vm2 = vcmask 523264   ;;  %s869_s15 = smov [#allocation2]  }
  0x27   :  { %731 = vmatpush3.msra.mxu0 %v108_v7  ;;  %351 = vmatprep.mubr.f32.mxu0 %v29_v8  ;;  %v105_v14 = vld [vmem:[%s1313_s2 + $0x258] sm:$0xff]  ;;  %v120_v15 = vld [vmem:[%s1313_s2 + $0x2d0] sm:$0xff]  ;;  %v119_v17 = vld [vmem:[%s1313_s2 + $0x2c8] sm:$0xff]  ;;  %v1232_v44 = vshrl.u32 %v143_v43, 7  ;;  %s634_s16 = sshll.u32 %s869_s15, 4  ;;  %s635_s16 = int_to_ptr.vmem [resolvable:$true] %s634_s16 }
  0x28   :  { %732 = vmatprep.subr.mxu0 %v123_v9  ;;  %v104_v16 = vld [vmem:[%s1313_s2 + $0x250] sm:$0xff]  ;;  %v103_v18 = vld [vmem:[%s1313_s2 + $0x248] sm:$0xff]  ;;  %v118_v19 = vld [vmem:[%s1313_s2 + $0x2c0] sm:$0xff]  ;;  %782 = vmatprep.subr.mxu1 %v867_v39  ;;  %s835_s17 = scalar_lea.vmem %s635_s16, 128  ;;  %p840_p1 = scmp.lt.s32.totalorder %s635_s16, %s635_s16 }
  0x29   :  { %733 = vmatpush3.msra.mxu0 %v107_v10  ;;  %v102_v20 = vld [vmem:[%s1313_s2 + $0x240] sm:$0xff]  ;;  %v117_v21 = vld [vmem:[%s1313_s2 + $0x2b8] sm:$0xff]  ;;  %v116_v23 = vld [vmem:[%s1313_s2 + $0x2b0] sm:$0xff]  ;;  %790 = vmatprep.mubr.msk.f32.mxu1 %vm868_vm0, %v867_v39  ;;  %v145_v46 = vsub.s32 0, %v1232_v44  ;;  %v360_v5 = vsub.s32 1, %v1232_v44  ;;  %vm599_vm3 = vcmp.lt.s32.totalorder %v1232_v44, 2  ;;  %p836_p0 = scmp.ne.s32.totalorder %s635_s16, %s835_s17  ;;  %p841_p2 = scmp.lt.s32.totalorder %s835_s17, %s835_s17 }
  0x2a   :  { %734 = vmatprep.subr.mxu0 %v122_v11  ;;  %v101_v22 = vld [vmem:[%s1313_s2 + $0x238] sm:$0xff]  ;;  %v100_v24 = vld [vmem:[%s1313_s2 + $0x230] sm:$0xff]  ;;  %v115_v25 = vld [vmem:[%s1313_s2 + $0x2a8] sm:$0xff] }
  0x2b   :  { %735 = vmatpush3.msra.mxu0 %v106_v12  ;;  %v99_v26 = vld [vmem:[%s1313_s2 + $0x228] sm:$0xff]  ;;  %v114_v27 = vld [vmem:[%s1313_s2 + $0x2a0] sm:$0xff]  ;;  %v113_v29 = vld [vmem:[%s1313_s2 + $0x298] sm:$0xff]  ;;  %p842_p3 = por %p841_p2, %p840_p1 }
  0x2c   :  { %736 = vmatprep.subr.mxu0 %v121_v13  ;;  %v98_v28 = vld [vmem:[%s1313_s2 + $0x220] sm:$0xff]  ;;  %v97_v30 = vld [vmem:[%s1313_s2 + $0x218] sm:$0xff]  ;;  %v112_v31 = vld [vmem:[%s1313_s2 + $0x290] sm:$0xff] }
  0x2d   :  { %737 = vmatpush3.msra.mxu0 %v105_v14  ;;  %v96_v32 = vld [vmem:[%s1313_s2 + $0x210] sm:$0xff]  ;;  %v111_v33 = vld [vmem:[%s1313_s2 + $0x288] sm:$0xff]  ;;  %v110_v35 = vld [vmem:[%s1313_s2 + $0x280] sm:$0xff]  ;;  %p843_p4 = pnand %p842_p3, %p836_p0 }
  0x2e   :  { %738 = vmatprep.subr.mxu0 %v120_v15  ;;  %v95_v34 = vld [vmem:[%s1313_s2 + $0x208] sm:$0xff]  ;;  %v94_v36 = vld [vmem:[%s1313_s2 + $0x200] sm:$0xff]  ;;  %v130_v38 = vld [vmem:[%s1315_s4 + $0x18] sm:$0xff]  ;;  %v439_v15 = vsub.s32 2, %v1232_v44 }
  0x2f   :  { %739 = vmatpush3.msra.mxu0 %v104_v16  ;;  %v28_v37 = vld [vmem:[%s1311_s0 + $0x20] sm:$0xff]  ;;  %v129_v40 = vld [vmem:[%s1315_s4 + $0x10] sm:$0xff]  ;;  %783 = vmatpush3.msra.mxu1 %v130_v38  ;;  %v128_v41 = vld [vmem:[%s1315_s4 + $0x8] sm:$0xff] }
  0x30   :  { %740 = vmatprep.subr.mxu0 %v119_v17  ;;  %784 = vmatprep.subr.mxu1 %v867_v39  ;;  %v127_v42 = vld [vmem:[%s1315_s4] sm:$0xff]  ;;  %v138_v60 = vld [vmem:[%s1315_s4 + $0x58] sm:$0xff]  ;;  %v137_v62 = vld [vmem:[%s1315_s4 + $0x50] sm:$0xff] }
  0x31   :  { %741 = vmatpush3.msra.mxu0 %v103_v18  ;;  %785 = vmatpush3.msra.mxu1 %v129_v40  ;;  %v1238_v47 = vld [vmem:[%s1314_s3] sm:$0xff]  ;;  %v136_v63 = vld [vmem:[%s1315_s4 + $0x48] sm:$0xff]  ;;  %v134_v1 = vld [vmem:[%s1315_s4 + $0x38] sm:$0xff] }
  0x32   :  { %742 = vmatprep.subr.mxu0 %v118_v19  ;;  %786 = vmatprep.subr.mxu1 %v867_v39  ;;  %v146_v50 = vrot.slane %v1238_v47, %v145_v46  ;;  %v135_v0 = vld [vmem:[%s1315_s4 + $0x40] sm:$0xff]  ;;  %v133_v2 = vld [vmem:[%s1315_s4 + $0x30] sm:$0xff]  ;;  %v132_v3 = vld [vmem:[%s1315_s4 + $0x28] sm:$0xff]  ;;  %v361_v6 = vrot.slane %v1238_v47, %v360_v5  ;;  %v440_v16 = vrot.slane %v1238_v47, %v439_v15 }
  0x33   :  { %743 = vmatpush3.msra.mxu0 %v102_v20  ;;  %787 = vmatpush3.msra.mxu1 %v128_v41  ;;  %v131_v4 = vld [vmem:[%s1315_s4 + $0x20] sm:$0xff]  ;;  %v142_v11 = vld [vmem:[%s1315_s4 + $0x78] sm:$0xff]  ;;  %v141_v12 = vld [vmem:[%s1315_s4 + $0x70] sm:$0xff] }
  0x34   :  { %744 = vmatprep.subr.mxu0 %v117_v21  ;;  %788 = vmatprep.subr.mxu1 %v867_v39  ;;  %v140_v13 = vld [vmem:[%s1315_s4 + $0x68] sm:$0xff]  ;;  %v139_v14 = vld [vmem:[%s1315_s4 + $0x60] sm:$0xff]  ;;  %v518_v21 = vsub.s32 3, %v1232_v44 }
  0x35   :  { %745 = vmatpush3.msra.mxu0 %v101_v22  ;;  %789 = vmatpush3.msra.mxu1 %v127_v42 }
  0x36   :  { %746 = vmatprep.subr.mxu0 %v116_v23  ;;  %793 = vmatprep.subr.mxu1 %v867_v39  ;;  %v519_v22 = vrot.slane %v1238_v47, %v518_v21 }
  0x37   :  { %747 = vmatpush3.msra.mxu0 %v100_v24 }
  0x38   :  { %748 = vmatprep.subr.mxu0 %v115_v25 }
  0x39   :  { %749 = vmatpush3.msra.mxu0 %v99_v26 }
  0x3a   :  { %750 = vmatprep.subr.mxu0 %v114_v27 }
  0x3b   :  { %751 = vmatpush3.msra.mxu0 %v98_v28 }
  0x3c   :  { %752 = vmatprep.subr.mxu0 %v113_v29 }
  0x3d   :  { %753 = vmatpush3.msra.mxu0 %v97_v30 }
  0x3e   :  { %754 = vmatprep.subr.mxu0 %v112_v31  ;;  %v594_v31 = vld [vmem:[%s1312_s1] sm:$0xff] }
  0x3f   :  { %755 = vmatpush3.msra.mxu0 %v96_v32  ;;  %v598_v32 = vand.u32 127, %v143_v43 }
  0x40   :  { %756 = vmatprep.subr.mxu0 %v111_v33 }
  0x41   :  { %757 = vmatpush3.msra.mxu0 %v95_v34  ;;  %vm600_vm4 = vcmp.lt.s32.totalorder %v598_v32, 8 }
  0x42   :  { %758 = vmatprep.subr.mxu0 %v110_v35  ;;  %vm601_vm5 = vmand %vm599_vm3, %vm600_vm4 }
  0x43   :  { %759 = vmatpush3.msra.mxu0 %v94_v36 }
  0x44   :  { %352 = vmatmul.mubr.f32.vlgmr.msra.gmra.mxu0 %v28_v37 }
  0xe2   :  { %v690_v45 = vpop.f32.mrf.mxu0 }
  0xe4   :  { %v691_v48 = vpop.f32.mrf.mxu0 }
  0xe5   :  { %v692_v51 = vadd.f32 %v691_v48, %v690_v45 }
  0xe6   :  { %v725_v49 = vpop.f32.mrf.mxu1 }
  0xe7   :  { %v214_v53 = vadd.f32 %v692_v51, %v146_v50 }
  0xe8   :  { %v726_v52 = vpop.f32.mrf.mxu1 }
  0xe9   :  { %v727_v54 = vadd.f32 %v726_v52, %v725_v49 }
  0xeb   :  { %v284_v57 = vadd.f32 %v727_v54, %v214_v53 }
 0x104   :  { %v760_v55 = vpop.f32.mrf.mxu0 }
 0x106   :  { %v761_v56 = vpop.f32.mrf.mxu0 }
 0x107   :  { %v762_v58 = vadd.f32 %v761_v56, %v760_v55 }
 0x109   :  { %v354_v59 = vadd.f32 %v762_v58, %v284_v57 }
 0x10b   :  { %829 = vtanh.f32 %v354_v59 }
 0x118   :  { %v830_v61 = vpop.eup %829 }
 0x119   :  { %791 = vmatmul.mubr.msk.f32.vlgmr.msra.gmra.mxu1 %vm362_vm1, %v830_v61 }
 0x11a   :  { %794 = vmatpush3.msra.mxu1 %v138_v60  ;;  %809 = vmatprep.mubr.msk.f32.mxu1 %vm868_vm0, %v867_v39 }
 0x11b   :  { %795 = vmatprep.subr.mxu1 %v867_v39 }
 0x11c   :  { %796 = vmatpush3.msra.mxu1 %v137_v62 }
 0x11d   :  { %797 = vmatprep.subr.mxu1 %v867_v39 }
 0x11e   :  { %798 = vmatpush3.msra.mxu1 %v136_v63 }
 0x11f   :  { %799 = vmatprep.subr.mxu1 %v867_v39 }
 0x120   :  { %800 = vmatpush3.msra.mxu1 %v135_v0 }
 0x121   :  { %801 = vmatprep.subr.mxu1 %v867_v39 }
 0x122   :  { %802 = vmatpush3.msra.mxu1 %v134_v1 }
 0x123   :  { %803 = vmatprep.subr.mxu1 %v867_v39 }
 0x124   :  { %804 = vmatpush3.msra.mxu1 %v133_v2 }
 0x125   :  { %805 = vmatprep.subr.mxu1 %v867_v39 }
 0x126   :  { %806 = vmatpush3.msra.mxu1 %v132_v3 }
 0x127   :  { %807 = vmatprep.subr.mxu1 %v867_v39 }
 0x128   :  { %808 = vmatpush3.msra.mxu1 %v131_v4 }
 0x129   :  { %812 = vmatprep.subr.mxu1 %v867_v39 }
 0x1d9   :  { %v432_v7 = vpop.f32.mrf.mxu1 }
 0x1da   :  { %v433_v8 = vadd.f32 %v432_v7, %v361_v6 }
 0x1db   :  { %v792_v9 = vpop.f32.mrf.mxu1 }
 0x1dc   :  { %v436_v10 = vmax.f32 %v433_v8, 0.0 }
 0x1de   :  { %810 = vmatmul.mubr.msk.f32.vlgmr.msra.gmra.mxu1 %vm441_vm2, %v436_v10 }
 0x1df   :  { %813 = vmatpush3.msra.mxu1 %v142_v11  ;;  %820 = vmatprep.mubr.msk.f32.mxu1 %vm868_vm0, %v867_v39 }
 0x1e0   :  { %814 = vmatprep.subr.mxu1 %v867_v39 }
 0x1e1   :  { %815 = vmatpush3.msra.mxu1 %v141_v12 }
 0x1e2   :  { %816 = vmatprep.subr.mxu1 %v867_v39 }
 0x1e3   :  { %817 = vmatpush3.msra.mxu1 %v140_v13 }
 0x1e4   :  { %818 = vmatprep.subr.mxu1 %v867_v39 }
 0x1e5   :  { %819 = vmatpush3.msra.mxu1 %v139_v14 }
 0x29e   :  { %v511_v17 = vpop.f32.mrf.mxu1 }
 0x29f   :  { %v512_v18 = vadd.f32 %v511_v17, %v440_v16 }
 0x2a0   :  { %v811_v19 = vpop.f32.mrf.mxu1 }
 0x2a1   :  { %v515_v20 = vmax.f32 %v512_v18, 0.0 }
 0x2a3   :  { %821 = vmatmul.mubr.msk.f32.vlgmr.msra.gmra.mxu1 %vm362_vm1, %v515_v20 }
 0x363   :  { %v589_v23 = vpop.f32.mrf.mxu1 }
 0x364   :  { %v590_v24 = vadd.f32 %v589_v23, %v519_v22 }
 0x365   :  { %v822_v25 = vpop.f32.mrf.mxu1 }
 0x366   :  { %v605_v26 = vand.u32 2147483647, %v590_v24  ;;  %593 = vst [vmem:[#allocation2] sm:$0xff] %v590_v24  ;;  %v602_v33 = vmax.f32 %v590_v24, 0.0  ;;  %v603_v34 = vmul.f32 %v594_v31, %v590_v24 }
 0x368   :  { %v606_v27 = vsub.f32 0.0, %v605_v26  ;;  %v604_v36 = vsub.f32 %v602_v33, %v603_v34 }
 0x36a   :  { %v607_v28 = vmul.f32 1.442695, %v606_v27 }
 0x36c   :  { %831 = vpow2.f32 %v607_v28 }
 0x379   :  { %v832_v29 = vpop.eup %831 }
 0x37a   :  { %v609_v30 = vadd.f32 1.0, %v832_v29 }
 0x37c   :  { %833 = vlog2.f32 %v609_v30 }
 0x389   :  { %v834_v35 = vpop.eup %833 }
 0x38a   :  { %v611_v37 = vmul.f32 0.6931472, %v834_v35 }
 0x38c   :  { %v612_v38 = vadd.f32 %v611_v37, %v604_v36 }
 0x38e   :  { %v613_v39 = vsel %vm601_vm5, %v612_v38, 0.0 }
 0x38f   :  { %614 = vadd.xlane.f32.xlu0 %v613_v39 }
 0x390   :  { %846 = shalt.err (!%p843_p4)
}
 0x391   :  { %637 = dma.vmem_to_hbm [thread:$0]  %s635_s16, 128, %s1316_s5, [#allocation3]  }
 0x392   :  { %s870_s20 = smov [#allocation5]  }
 0x418   :  { %v615_v40 = vpop.xlane.xlu0 %614 }
 0x419   :  { %v616_v41 = vrot.slane %v615_v40, 4 }
 0x41b   :  { %v617_v42 = vadd.f32 %v616_v41, %v615_v40 }
 0x41d   :  { %v618_v43 = vrot.slane %v617_v42, 2 }
 0x41f   :  { %v619_v44 = vadd.f32 %v618_v43, %v617_v42 }
 0x421   :  { %v620_v45 = vrot.slane %v619_v44, 1 }
 0x423   :  { %v621_v46 = vadd.f32 %v620_v45, %v619_v44 }
 0x425   :  { %823 = vpush %v621_v46 }
 0x456   :  { %s824_s3 = spop %823 }
 0x457   :  { %s625_s19 = smul.f32 0.0625, %s824_s3 }
 0x459   :  { %627 = sst [smem:[#allocation5]] %s625_s19 }
 0x45a   :  { %645 = dma.smem_to_hbm %s870_s20, 16, %s1317_s6, [#allocation4]  }
 0x45b   :  { %863 = dma.done.wait [#allocation3], 128  }
 0x45c   :  { %864 = vsyncadd [#allocation3], 4294967168 }
 0x45d   :  { %865 = dma.done.wait [#allocation4], 16  }
 0x45e   :  { %866 = vsyncadd [#allocation4], 4294967280 }
 0x45f   :  { %652 = sfence }
 0x460   :  { %653 = vsyncpa [#allocation3], 1 }
 0x461   :  { %654 = vsyncpa [#allocation4], 1 }

</bundles_post_ra>
